<compile_context>
chip_gen: v7x
topology: tpu7x:2x2x1
jax: 0.10.0
libtpu: 0.0.40
codegen_flags: <defaults>
</compile_context>

<pallas_src>
import functools
import math

import jax
import jax.numpy as jnp
from jax.experimental import pallas as pl
from jax.experimental.pallas import tpu as pltpu

_INV_SQRT2 = 1.0 / math.sqrt(2.0)   # hoisted GELU constant


def _round_up(a, b):
    return -(-a // b) * b


def _embed_fc_kernel(x_ref, w1_ref, b1_ref, w2_ref, b2_ref, o_ref, *, exact_gelu):
    # x_ref:  (tile_n, input_dim)                           streamed per grid step
    # w1_ref: (input_dim, emb_pad)   b1_ref: (1, emb_pad)   VMEM-resident (const index_map)
    # w2_ref: (emb_pad,  emb_pad)    b2_ref: (1, emb_pad)   VMEM-resident (const index_map)
    # o_ref:  (tile_n, emb_dim)                             streamed per grid step
    #
    # Matmul 1: cast x to the weight dtype (bf16 by default) so the MXU runs its
    # native single-pass path; accumulate in f32.
    x = x_ref[...].astype(w1_ref.dtype)
    h = jnp.dot(x, w1_ref[...], preferred_element_type=jnp.float32) + b1_ref[...]

    if exact_gelu:
        # Exact (erf-based) GELU == PyTorch nn.GELU() default, kept in f32.
        h = 0.5 * h * (1.0 + jax.lax.erf(h * _INV_SQRT2))
    else:
        # tanh-approx: transcendental lands on the EUP slot instead of VALU.
        h = jax.nn.gelu(h, approximate=True)

    # Matmul 2: single downcast of the activation right before the MXU op.
    out = jnp.dot(h.astype(w2_ref.dtype), w2_ref[...],
                  preferred_element_type=jnp.float32) + b2_ref[...]

    # o_ref may be narrower than the padded compute width (emb_dim not a multiple
    # of 128, e.g. 32): store the valid columns directly so no separate XLA slice
    # pass (and no padded-column HBM writeback) is needed.  No-op when pad == 0.
    o_ref[...] = out[:, : o_ref.shape[1]].astype(o_ref.dtype)


def embed_fc(x, w1, b1, w2, b2, *, input_dim, tile_n=2048,
             matmul_dtype=jnp.bfloat16, exact_gelu=True):
    """Pallas implementation of EmbedFC.forward.

    x : any shape whose elements flatten to (-1, input_dim)
    w1: (input_dim, emb_dim)   b1: (emb_dim,)      (weights stored as (in, out))
    w2: (emb_dim, emb_dim)     b2: (emb_dim,)
    returns: (N, emb_dim) with N = x.size // input_dim, dtype = x.dtype
    """
    x2 = x.reshape(-1, input_dim)
    n = x2.shape[0]
    emb_dim = w1.shape[1]

    # ---- lane-dense compute width: zero-pad emb_dim up to a multiple of 128 ---------
    # Pad columns stay exact zeros through both matmuls and GELU, so valid columns are
    # bit-identical to the unpadded computation.  The output itself is NOT padded.
    emb_pad = _round_up(emb_dim, 128)
    pad = emb_pad - emb_dim
    w1p = jnp.pad(w1, ((0, 0), (0, pad))) if pad else w1
    w2p = jnp.pad(w2, ((0, pad), (0, pad))) if pad else w2
    b1p = (jnp.pad(b1, ((0, pad),)) if pad else b1).astype(jnp.float32).reshape(1, emb_pad)
    b2p = (jnp.pad(b2, ((0, pad),)) if pad else b2).astype(jnp.float32).reshape(1, emb_pad)

    # Native bf16 MXU path for both matmuls (f32 accumulation inside the kernel).
    w1p = w1p.astype(matmul_dtype)
    w2p = w2p.astype(matmul_dtype)

    x_isz = jnp.dtype(x2.dtype).itemsize
    w_isz = jnp.dtype(matmul_dtype).itemsize
    quantum = {4: 8, 2: 16, 1: 32}.get(x_isz, 8)      # sublane quantum of the activation dtype

    # ---- VMEM budgeting: cap tile_n so double-buffered tiles + intermediates fit ----
    weights_bytes = 2 * ((input_dim * emb_pad + emb_pad * emb_pad) * w_isz + 2 * emb_pad * 4)
    per_row_bytes = (2 * input_dim * x_isz        # x tile, double-buffered
                     + 2 * emb_dim * x_isz        # out tile, double-buffered
                     + 3 * emb_pad * 4)           # f32 intermediates (h, out) + slack
    budget = 40 << 20                              # safe on v5e/v6e/v7x
    tile_cap = max(quantum,
                   ((budget - weights_bytes) // per_row_bytes) // quantum * quantum)
    tile_n = min(tile_n, tile_cap)

    # ---- row tiling ------------------------------------------------------------------
    if n <= quantum:
        tile_n = n                                 # single block == full dim (always legal)
    else:
        # Keep >= 2 grid blocks so the "parallel" axis shards across both v7x TCs.
        two_block = _round_up(-(-n // 2), quantum)
        tile_n = max(quantum, min((tile_n // quantum) * quantum, two_block))
    num_blocks = pl.cdiv(n, tile_n)

    cost = pl.CostEstimate(
        flops=2 * n * (input_dim * emb_pad + emb_pad * emb_pad),
        transcendentals=n * emb_pad,
        bytes_accessed=(n * input_dim * x_isz + n * emb_dim * x_isz
                        + (input_dim + emb_pad) * emb_pad * w_isz + 2 * emb_pad * 4),
    )

    vmem_needed = weights_bytes + tile_n * per_row_bytes + (4 << 20)
    vmem_limit = int(min(64 << 20, max(32 << 20, vmem_needed)))

    kernel = functools.partial(_embed_fc_kernel, exact_gelu=exact_gelu)

    return pl.pallas_call(
        kernel,
        out_shape=jax.ShapeDtypeStruct((n, emb_dim), x.dtype),
        grid=(num_blocks,),
        in_specs=[
            pl.BlockSpec((tile_n, input_dim), lambda i: (i, 0)),    # x: streamed
            pl.BlockSpec((input_dim, emb_pad), lambda i: (0, 0)),   # w1: resident
            pl.BlockSpec((1, emb_pad), lambda i: (0, 0)),           # b1: resident
            pl.BlockSpec((emb_pad, emb_pad), lambda i: (0, 0)),     # w2: resident
            pl.BlockSpec((1, emb_pad), lambda i: (0, 0)),           # b2: resident
        ],
        out_specs=pl.BlockSpec((tile_n, emb_dim), lambda i: (i, 0)),
        compiler_params=pltpu.CompilerParams(
            dimension_semantics=("parallel",),     # rows independent -> megacore on v7x
            vmem_limit_bytes=vmem_limit,
        ),
        cost_estimate=cost,
    )(x2, w1p, b1p, w2p, b2p)


def _init_linear(key, fan_in, fan_out, dtype=jnp.float32):
    # PyTorch nn.Linear default init: U(-1/sqrt(fan_in), 1/sqrt(fan_in)),
    # stored as (in, out) == transpose of torch's (out, in).
    kw, kb = jax.random.split(key)
    bound = 1.0 / math.sqrt(fan_in)
    w = jax.random.uniform(kw, (fan_in, fan_out), dtype, minval=-bound, maxval=bound)
    b = jax.random.uniform(kb, (fan_out,), dtype, minval=-bound, maxval=bound)
    return w, b


if __name__ == "__main__":
    key = jax.random.PRNGKey(0)
    k_x, k_l1, k_l2, k_l3, k_l4 = jax.random.split(key, 5)

    def run_case(x, input_dim, emb_dim, k1, k2):
        w1, b1 = _init_linear(k1, input_dim, emb_dim)
        w2, b2 = _init_linear(k2, emb_dim, emb_dim)

        out = embed_fc(x, w1, b1, w2, b2, input_dim=input_dim)
        out = jax.block_until_ready(out)

        x2 = x.reshape(-1, input_dim)
        n = x2.shape[0]
        assert out.shape == (n, emb_dim), out.shape

        # Reference matching the kernel recipe (bf16 matmuls, f32 accum, exact GELU).
        bf = jnp.bfloat16
        h = jnp.dot(x2.astype(bf), w1.astype(bf), preferred_element_type=jnp.float32) + b1
        h = 0.5 * h * (1.0 + jax.lax.erf(h * _INV_SQRT2))
        ref = jnp.dot(h.astype(bf), w2.astype(bf), preferred_element_type=jnp.float32) + b2
        assert jnp.allclose(out, ref, atol=1e-4, rtol=1e-4), \
            float(jnp.max(jnp.abs(out - ref)))

        # Loose sanity check against the exact f32 PyTorch-semantics forward.
        ref32 = jax.nn.gelu(x2 @ w1 + b1, approximate=False) @ w2 + b2
        assert jnp.allclose(out, ref32, atol=5e-2, rtol=5e-2)

    # Case 1: emb_dim not a multiple of 128 -> padded compute width (32 -> 128),
    # direct unpadded output store, 2 grid blocks with a partial last block.
    x1 = jax.random.normal(k_x, (6, 11, 8), dtype=jnp.float32)   # view(-1, 8) -> (66, 8)
    run_case(x1, 8, 32, k_l1, k_l2)

    # Case 2: emb_dim = 128 -> fully lane-dense path, no padding at all.
    x2_in = jax.random.normal(k_x, (2, 4, 16), dtype=jnp.float32)  # view(-1, 16) -> (8, 16)
    run_case(x2_in, 16, 128, k_l3, k_l4)

    print("KERNEL_OK")
</pallas_src>

<mosaic_0001>
module attributes {stable_mosaic.version = 11 : i64} {
  func.func @_embed_fc_kernel(%arg0: i32, %arg1: memref<40x8xf32, #tpu.memory_space<vmem>>, %arg2: memref<8x128xbf16, #tpu.memory_space<vmem>>, %arg3: memref<1x128xf32, #tpu.memory_space<vmem>>, %arg4: memref<128x128xbf16, #tpu.memory_space<vmem>>, %arg5: memref<1x128xf32, #tpu.memory_space<vmem>>, %arg6: memref<40x32xf32, #tpu.memory_space<vmem>>) attributes {dimension_semantics = [#tpu.dimension_semantics<parallel>], iteration_bounds = array<i64: 2>, scalar_prefetch = 0 : i64, scratch_operands = 0 : i64, tpu.core_type = #tpu.core_type<tc>, window_params = [{transform_indices = @transform_0, window_bounds = array<i64: 40, 8>}, {pipeline_mode = #tpu.pipeline_mode<synchronous>, transform_indices = @transform_1, window_bounds = array<i64: 8, 128>}, {pipeline_mode = #tpu.pipeline_mode<synchronous>, transform_indices = @transform_2, window_bounds = array<i64: 1, 128>}, {pipeline_mode = #tpu.pipeline_mode<synchronous>, transform_indices = @transform_3, window_bounds = array<i64: 128, 128>}, {pipeline_mode = #tpu.pipeline_mode<synchronous>, transform_indices = @transform_4, window_bounds = array<i64: 1, 128>}, {transform_indices = @transform_5, window_bounds = array<i64: 40, 32>}]} {
    %c0 = arith.constant 0 : index
    %c0_0 = arith.constant 0 : index
    %0 = vector.load %arg1[%c0, %c0_0] : memref<40x8xf32, #tpu.memory_space<vmem>>, vector<40x8xf32>
    %1 = arith.truncf %0 : vector<40x8xf32> to vector<40x8xbf16>
    %c0_1 = arith.constant 0 : index
    %c0_2 = arith.constant 0 : index
    %2 = vector.load %arg2[%c0_1, %c0_2] : memref<8x128xbf16, #tpu.memory_space<vmem>>, vector<8x128xbf16>
    %cst = arith.constant dense<0.000000e+00> : vector<40x128xf32>
    %3 = tpu.matmul %1, %2, %cst {dimension_numbers = #tpu.dot_dimension_numbers<[1], [0], [0], [1], [0, 0, 1, 1], [], []>} : vector<40x8xbf16>, vector<8x128xbf16>, vector<40x128xf32> -> vector<40x128xf32>
    %c0_3 = arith.constant 0 : index
    %c0_4 = arith.constant 0 : index
    %4 = vector.load %arg3[%c0_3, %c0_4] : memref<1x128xf32, #tpu.memory_space<vmem>>, vector<1x128xf32>
    %5 = vector.broadcast %4 : vector<1x128xf32> to vector<40x128xf32>
    %6 = arith.addf %3, %5 : vector<40x128xf32>
    %cst_5 = arith.constant 5.000000e-01 : f32
    %7 = vector.broadcast %cst_5 : f32 to vector<40x128xf32>
    %8 = arith.mulf %7, %6 : vector<40x128xf32>
    %cst_6 = arith.constant 0.707106769 : f32
    %9 = vector.broadcast %cst_6 : f32 to vector<40x128xf32>
    %10 = arith.mulf %6, %9 : vector<40x128xf32>
    %11 = math.erf %10 : vector<40x128xf32>
    %cst_7 = arith.constant 1.000000e+00 : f32
    %12 = vector.broadcast %cst_7 : f32 to vector<40x128xf32>
    %13 = arith.addf %12, %11 : vector<40x128xf32>
    %14 = arith.mulf %8, %13 : vector<40x128xf32>
    %15 = arith.truncf %14 : vector<40x128xf32> to vector<40x128xbf16>
    %c0_8 = arith.constant 0 : index
    %c0_9 = arith.constant 0 : index
    %16 = vector.load %arg4[%c0_8, %c0_9] : memref<128x128xbf16, #tpu.memory_space<vmem>>, vector<128x128xbf16>
    %cst_10 = arith.constant dense<0.000000e+00> : vector<40x128xf32>
    %17 = tpu.matmul %15, %16, %cst_10 {dimension_numbers = #tpu.dot_dimension_numbers<[1], [0], [0], [1], [0, 0, 1, 1], [], []>} : vector<40x128xbf16>, vector<128x128xbf16>, vector<40x128xf32> -> vector<40x128xf32>
    %c0_11 = arith.constant 0 : index
    %c0_12 = arith.constant 0 : index
    %18 = vector.load %arg5[%c0_11, %c0_12] : memref<1x128xf32, #tpu.memory_space<vmem>>, vector<1x128xf32>
    %19 = vector.broadcast %18 : vector<1x128xf32> to vector<40x128xf32>
    %20 = arith.addf %17, %19 : vector<40x128xf32>
    %21 = vector.extract_strided_slice %20 {offsets = [0, 0], sizes = [40, 32], strides = [1, 1]} : vector<40x128xf32> to vector<40x32xf32>
    %c0_13 = arith.constant 0 : index
    %c0_14 = arith.constant 0 : index
    %22 = vector.load %arg6[%c0_13, %c0_14] : memref<40x32xf32, #tpu.memory_space<vmem>>, vector<40x32xf32>
    tpu.vector_store %arg6[%c0_13, %c0_14], %21 {strides = array<i32>} : memref<40x32xf32, #tpu.memory_space<vmem>>, vector<40x32xf32>,
    return
  }
  func.func @transform_0(%arg0: i32) -> (i32, i32) {
    %c0_i32 = arith.constant 0 : i32
    %c0_i32_0 = arith.constant 0 : i32
    return %arg0, %c0_i32 : i32, i32
  }
  func.func @transform_1(%arg0: i32) -> (i32, i32) {
    %c0_i32 = arith.constant 0 : i32
    %c0_i32_0 = arith.constant 0 : i32
    %c0_i32_1 = arith.constant 0 : i32
    return %c0_i32, %c0_i32_0 : i32, i32
  }
  func.func @transform_2(%arg0: i32) -> (i32, i32) {
    %c0_i32 = arith.constant 0 : i32
    %c0_i32_0 = arith.constant 0 : i32
    %c0_i32_1 = arith.constant 0 : i32
    return %c0_i32, %c0_i32_0 : i32, i32
  }
  func.func @transform_3(%arg0: i32) -> (i32, i32) {
    %c0_i32 = arith.constant 0 : i32
    %c0_i32_0 = arith.constant 0 : i32
    %c0_i32_1 = arith.constant 0 : i32
    return %c0_i32, %c0_i32_0 : i32, i32
  }
  func.func @transform_4(%arg0: i32) -> (i32, i32) {
    %c0_i32 = arith.constant 0 : i32
    %c0_i32_0 = arith.constant 0 : i32
    %c0_i32_1 = arith.constant 0 : i32
    return %c0_i32, %c0_i32_0 : i32, i32
  }
  func.func @transform_5(%arg0: i32) -> (i32, i32) {
    %c0_i32 = arith.constant 0 : i32
    %c0_i32_0 = arith.constant 0 : i32
    return %arg0, %c0_i32 : i32, i32
  }
}

</mosaic_0001>

<bundles_post_ra>
// kernel: tpu_custom_call.1
= control target key start
LH: loop header
LB: loop body
LE: loop exit
PB: predicated region body
PF: predicated region fallthrough
CT: control target
= control target key end

     0   :  { %s1065_s18 = smov 0   ;;  %s1067_s19 = smov 0   ;;  %s1236_s0 = inlined_call_operand.vmem [shape: f32[66,8], index: 0, kind: input, shape index: {}]   ;;  %s1237_s1 = inlined_call_operand.vmem [shape: bf16[8,128], index: 1, kind: input, shape index: {}]   ;;  %s1238_s2 = inlined_call_operand.vmem [shape: f32[1,128], index: 2, kind: input, shape index: {}]   ;;  %s1239_s3 = inlined_call_operand.vmem [shape: bf16[128,128], index: 3, kind: input, shape index: {}]   ;;  %s1240_s4 = inlined_call_operand.vmem [shape: f32[1,128], index: 4, kind: input, shape index: {}]   ;;  %s1241_s5 = inlined_call_operand.vmem [shape: f32[66,32], index: 5, kind: output, shape index: {}]  }
   0x1   :  { %s1069_s20 = smov 0  }
   0x2 LB: > { %s1078_s21 = sadd.s32 4294967295, %s999_s20   ;;  %s1080_s22 = sadd.s32 1, %s999_s20   ;;  %s999_s20 = sphi %s1069_s20, %s1248_s20   ;;  %s995_s19 = sphi %s1067_s19, %s1247_s19   ;;  %s991_s18 = sphi %s1065_s18, %s1246_s18  }
   0x3   : > { %s129_s23 = ssub.s32 %s999_s20, %s1080_s22  ;;  %s132_s24 = sadd.s32 1, %s995_s19 }
   0x4   : > { %p130_p0 = scmp.eq.s32.totalorder %s129_s23, 0  ;;  %p142_p1 = scmp.ne.s32.totalorder %s995_s19, %s991_s18 }
   0x5   : > { %p143_p2 = scmp.eq.s32.totalorder %s1078_s21, 1  ;;  %p730_p3 = scmp.ge.s32.totalorder %s999_s20, 1 }
   0x6   : > { %s1088_s25 = scalar_select %p130_p0, %s995_s19, %s132_s24  }
   0x7   : > { %p1090_p4 = por %p143_p2, %p142_p1  ;;  %p196_p5 = scmp.lt.s32.totalorder %s999_s20, 3 }
   0x9   : > { %p197_p6 = pnand %p730_p3, %p196_p5 }
   0xa   : > { %v255_v0 = vld [vmem:[%s1237_s1] sm:$0xf] (!%p197_p6)  ;;  %vm273_vm0 = vcmask (!%p197_p6), 1043456   ;;  %s1098_s29 = smul.u32 (!%p197_p6), 5, %s1078_s21  ;;  %v1033_v1 = vmov (!%p197_p6), 0.0   ;;  %vm1034_vm1 = vmmov (!%p197_p6), 0  }
   0xb   : > { %200 = sbr.rel (%p197_p6) target bundleno = 552 (0x228), region = 40  ;;  %773 = vmatprep.subr.bf16.mxu0 (!%p197_p6), %v1033_v1  ;;  %v275_v2 = vsel (!%p197_p6), %vm273_vm0, %v255_v0, 0  ;;  %775 = vmatprep.mubr.msk.bf16.mxu0 (!%p197_p6), %vm1034_vm1, %v1033_v1  ;;  %v923_v3 = vld [vmem:[%s1239_s3] sm:$0xff] (!%p197_p6)   ;;  %v924_v4 = vld [vmem:[%s1239_s3 + $0x8] sm:$0xff] (!%p197_p6)   ;;  %vm263_vm2 = vcmask (!%p197_p6), 64512   ;;  %v925_v13 = vld [vmem:[%s1239_s3 + $0x10] sm:$0xff] (!%p197_p6)  }
   0xc   : > { %774 = vmatpush3.bf16.msra.mxu0 (!%p197_p6), %v275_v2  ;;  %p232_p7 = scmp.lt.s32.totalorder (!%p197_p6), %s1098_s29, 8  ;;  %815 = vmatprep.subr.bf16.mxu1 (!%p197_p6), %v1033_v1  ;;  %v926_v14 = vld [vmem:[%s1239_s3 + $0x18] sm:$0xff] (!%p197_p6)   ;;  %v927_v15 = vld [vmem:[%s1239_s3 + $0x20] sm:$0xff] (!%p197_p6)   ;;  %v928_v16 = vld [vmem:[%s1239_s3 + $0x28] sm:$0xff] (!%p197_p6)   ;;  %s224_s10 = sand.u32 (!%p197_p6), 1, %s991_s18   ;;  %vm488_vm3 = vcmask (!%p197_p6), 261120  }
   0xd   : > { %787 = vmatprep.subr.bf16.mxu0 (!%p197_p6), %v1033_v1  ;;  %807 = vmatprep.mubr.msk.bf16.mxu1 (!%p197_p6), %vm1034_vm1, %v1033_v1  ;;  %v929_v17 = vld [vmem:[%s1239_s3 + $0x30] sm:$0xff] (!%p197_p6)   ;;  %v930_v18 = vld [vmem:[%s1239_s3 + $0x38] sm:$0xff] (!%p197_p6)   ;;  %v732_v19 = vld [vmem:[%s1238_s2] ss:$0 sm:$0xff] (!%p197_p6)  ;;  %s831_s11 = smul.u32 (!%p197_p6), 40, %s224_s10 }
   0xe   : > { %823 = vmatpush3.bf16.msra.mxu1 (!%p197_p6), %v923_v3  ;;  %v736_v2 = vld [vmem:[%s1240_s4] ss:$0 sm:$0xff] (!%p197_p6) }
   0xf   : > { %816 = vmatprep.subr.bf16.mxu1 (!%p197_p6), %v1033_v1  ;;  %s1168_s14 = scalar_lea.vmem (!%p197_p6), [#allocation2], %s831_s11  }
  0x12   : > { %s233_s7 = scalar_select %p232_p7, %s1098_s29, 8  ;;  %824 = vmatpush3.bf16.msra.mxu1 %v924_v4 }
  0x13   : > { %817 = vmatprep.subr.bf16.mxu1 %v1033_v1  ;;  %s502_s18 = ssub.s32 (%p1090_p4), 9, %s1098_s29  ;;  %s757_s15 = smul.u32 (%p1090_p4), 40, %s1078_s21 }
  0x14   : > { %s731_s8 = sshll.u32 %s233_s7, 3  ;;  %p503_p8 = scmp.lt.s32.totalorder (%p1090_p4), %s502_s18, 5 }
  0x15   : > { %s235_s13 = scalar_lea.vmem %s1236_s0, %s731_s8  ;;  %s1187_s20 = scalar_lea.vmem (%p1090_p4), %s1241_s5, %s757_s15  }
  0x16   : > { %v247_v5 = vld [vmem:[%s235_s13] sm:$0xff]  ;;  %v248_v6 = vld [vmem:[%s235_s13 + $0x8] sm:$0xff]  ;;  %v249_v8 = vld [vmem:[%s235_s13 + $0x10] sm:$0xff]  ;;  %825 = vmatpush3.bf16.msra.mxu1 %v925_v13 }
  0x17   : > { %v252_v7 = vpack.c.bf16 %v248_v6, %v247_v5  ;;  %v250_v9 = vld [vmem:[%s235_s13 + $0x18] sm:$0xff]  ;;  %v251_v11 = vld [vmem:[%s235_s13 + $0x20] sm:$0xff]  ;;  %818 = vmatprep.subr.bf16.mxu1 %v1033_v1 }
  0x18   : > { %v253_v10 = vpack.c.bf16 %v250_v9, %v249_v8  ;;  %v254_v12 = vpack.c.bf16 %v251_v11, %v251_v11 }
  0x19   : > { %776 = vmatmul.mubr.msk.bf16.vlgmr.msra.gmra.mrb[0].mxu0 %vm263_vm2, %v252_v7 }
  0x1a   : > { %779 = vmatprep.mubr.msk.bf16.mxu0 %vm1034_vm1, %v1033_v1  ;;  %788 = vmatpush3.bf16.msra.mxu0 %v923_v3 }
  0x1b   : > { %789 = vmatprep.subr.bf16.mxu0 %v1033_v1  ;;  %826 = vmatpush3.bf16.msra.mxu1 %v926_v14 }
  0x1c   : > { %819 = vmatprep.subr.bf16.mxu1 %v1033_v1 }
  0x1e   : > { %790 = vmatpush3.bf16.msra.mxu0 %v924_v4 }
  0x1f   : > { %791 = vmatprep.subr.bf16.mxu0 %v1033_v1  ;;  %827 = vmatpush3.bf16.msra.mxu1 %v927_v15 }
  0x20   : > { %820 = vmatprep.subr.bf16.mxu1 %v1033_v1 }
  0x21   : > { %780 = vmatmul.mubr.msk.bf16.gmra.mrb[4].mxu0 %vm263_vm2, %v253_v10 }
  0x22   : > { %783 = vmatprep.mubr.msk.bf16.mxu0 %vm1034_vm1, %v1033_v1  ;;  %792 = vmatpush3.bf16.msra.mxu0 %v925_v13 }
  0x23   : > { %793 = vmatprep.subr.bf16.mxu0 %v1033_v1  ;;  %828 = vmatpush3.bf16.msra.mxu1 %v928_v16 }
  0x24   : > { %821 = vmatprep.subr.bf16.mxu1 %v1033_v1 }
  0x26   : > { %794 = vmatpush3.bf16.msra.mxu0 %v926_v14 }
  0x27   : > { %795 = vmatprep.subr.bf16.mxu0 %v1033_v1  ;;  %829 = vmatpush3.bf16.msra.mxu1 %v929_v17 }
  0x28   : > { %822 = vmatprep.subr.bf16.mxu1 %v1033_v1 }
  0x29   : > { %784 = vmatmul.mubr.msk.bf16.gmra.mrb[8].mxu0 %vm263_vm2, %v254_v12 }
  0x2a   : > { %803 = vmatprep.mubr.msk.bf16.mxu0 %vm1034_vm1, %v1033_v1  ;;  %796 = vmatpush3.bf16.msra.mxu0 %v927_v15 }
  0x2b   : > { %797 = vmatprep.subr.bf16.mxu0 %v1033_v1  ;;  %830 = vmatpush3.bf16.msra.mxu1 %v930_v18 }
  0x2e   : > { %798 = vmatpush3.bf16.msra.mxu0 %v928_v16 }
  0x2f   : > { %799 = vmatprep.subr.bf16.mxu0 %v1033_v1 }
  0x32   : > { %800 = vmatpush3.bf16.msra.mxu0 %v929_v17 }
  0x33   : > { %801 = vmatprep.subr.bf16.mxu0 %v1033_v1 }
  0x36   : > { %802 = vmatpush3.bf16.msra.mxu0 %v930_v18 }
  0xec   : > { %v311_v20 = vpop.f32.mrb[0].mxu0 }
  0xed   : > { %v312_v21 = vadd.f32 %v732_v19, %v311_v20  ;;  %v777_v22 = vpop.f32.mrb[1].mxu0 }
  0xee   : > { %v314_v23 = vpop.f32.mrb[2].mxu0 }
  0xef   : > { %v338_v24 = vmul.f32 0.70710677, %v312_v21  ;;  %v315_v25 = vadd.f32 %v732_v19, %v314_v23  ;;  %v778_v26 = vpop.f32.mrb[3].mxu0  ;;  %v333_v42 = vmul.f32 0.5, %v312_v21 }
  0xf1   : > { %931 = verf.f32 %v338_v24  ;;  %v339_v27 = vmul.f32 0.70710677, %v315_v25  ;;  %v334_v43 = vmul.f32 0.5, %v315_v25 }
  0xf3   : > { %933 = verf.f32 %v339_v27 }
  0xf4   : > { %v319_v28 = vpop.f32.mrb[4].mxu0 }
  0xf5   : > { %v320_v29 = vadd.f32 %v732_v19, %v319_v28  ;;  %v781_v30 = vpop.f32.mrb[5].mxu0 }
  0xf6   : > { %v322_v31 = vpop.f32.mrb[6].mxu0 }
  0xf7   : > { %v340_v32 = vmul.f32 0.70710677, %v320_v29  ;;  %v323_v33 = vadd.f32 %v732_v19, %v322_v31  ;;  %v782_v34 = vpop.f32.mrb[7].mxu0  ;;  %v335_v54 = vmul.f32 0.5, %v320_v29 }
  0xf9   : > { %935 = verf.f32 %v340_v32  ;;  %v341_v35 = vmul.f32 0.70710677, %v323_v33  ;;  %v336_v55 = vmul.f32 0.5, %v323_v33 }
  0xfb   : > { %v932_v36 = vpop.eup %931  ;;  %937 = verf.f32 %v341_v35 }
  0xfc   : > { %v348_v37 = vadd.f32 1.0, %v932_v36  ;;  %v327_v38 = vpop.f32.mrb[8].mxu0 }
  0xfd   : > { %v934_v39 = vpop.eup %933  ;;  %v328_v40 = vadd.f32 %v732_v19, %v327_v38  ;;  %v785_v41 = vpop.f32.mrb[9].mxu0 }
  0xfe   : > { %v349_v44 = vadd.f32 1.0, %v934_v39  ;;  %v330_v45 = vpop.f32.mrb[10].mxu0  ;;  %v353_v48 = vmul.f32 %v348_v37, %v333_v42 }
  0xff   : > { %v342_v46 = vmul.f32 0.70710677, %v328_v40  ;;  %v786_v47 = vpop.f32.mrb[11].mxu0  ;;  %v337_v61 = vmul.f32 0.5, %v328_v40 }
 0x100   : > { %v354_v49 = vmul.f32 %v349_v44, %v334_v43 }
 0x101   : > { %939 = verf.f32 %v342_v46 }
 0x102   : > { %v358_v50 = vpack.c.bf16 %v354_v49, %v353_v48 }
 0x103   : > { %v936_v51 = vpop.eup %935 }
 0x104   : > { %v350_v52 = vadd.f32 1.0, %v936_v51  ;;  %804 = vmatmul.mubr.bf16.vlgmr.msra.gmra.mrb[12].mxu0 %v358_v50 }
 0x105   : > { %v938_v53 = vpop.eup %937 }
 0x106   : > { %v351_v56 = vadd.f32 1.0, %v938_v53  ;;  %v355_v57 = vmul.f32 %v350_v52, %v335_v54 }
 0x108   : > { %v356_v58 = vmul.f32 %v351_v56, %v336_v55 }
 0x10a   : > { %v359_v59 = vpack.c.bf16 %v356_v58, %v355_v57 }
 0x10b   : > { %v940_v60 = vpop.eup %939 }
 0x10c   : > { %v352_v62 = vadd.f32 1.0, %v940_v60  ;;  %808 = vmatmul.mubr.bf16.vlgmr.msra.gmra.mrb[0].mxu1 %v359_v59 }
 0x10d   : > { %811 = vmatprep.mubr.msk.bf16.mxu1 %vm1034_vm1, %v1033_v1 }
 0x10e   : > { %v357_v63 = vmul.f32 %v352_v62, %v337_v61 }
 0x110   : > { %v360_v0 = vpack.c.bf16 %v357_v63, %v357_v63 }
 0x114   : > { %812 = vmatmul.mubr.bf16.gmra.mrb[4].mxu1 %v360_v0 }
 0x1d7   : > { %v466_v3 = vpop.f32.mrb[12].mxu0 }
 0x1d8   : > { %v467_v4 = vadd.f32 %v736_v2, %v466_v3  ;;  %v805_v5 = vpop.f32.mrb[13].mxu0 }
 0x1d9   : > { %v469_v6 = vpop.f32.mrb[14].mxu0 }
 0x1da   : > { %489 = vst.msk [vmem:[%s1168_s14] sm:$0xff] %vm488_vm3, %v467_v4  ;;  %v470_v1 = vadd.f32 %v736_v2, %v469_v6  ;;  %v806_v7 = vpop.f32.mrb[15].mxu0 }
 0x1dc   : > { %490 = vst.msk [vmem:[%s1168_s14 + $0x8] sm:$0xff] %vm488_vm3, %v470_v1 }
 0x1df   : > { %v474_v8 = vpop.f32.mrb[0].mxu1 }
 0x1e0   : > { %v475_v9 = vadd.f32 %v736_v2, %v474_v8  ;;  %v809_v10 = vpop.f32.mrb[1].mxu1 }
 0x1e1   : > { %v477_v11 = vpop.f32.mrb[2].mxu1 }
 0x1e2   : > { %491 = vst.msk [vmem:[%s1168_s14 + $0x10] sm:$0xff] %vm488_vm3, %v475_v9  ;;  %v478_v12 = vadd.f32 %v736_v2, %v477_v11  ;;  %v810_v13 = vpop.f32.mrb[3].mxu1 }
 0x1e4   : > { %492 = vst.msk [vmem:[%s1168_s14 + $0x18] sm:$0xff] %vm488_vm3, %v478_v12  ;;  %500 = sbr.rel (!%p1090_p4) target bundleno = 552 (0x228), region = 44 }
 0x1e7   : > { %v482_v14 = vpop.f32.mrb[4].mxu1 }
 0x1e8   : > { %v483_v15 = vadd.f32 %v736_v2, %v482_v14  ;;  %v813_v16 = vpop.f32.mrb[5].mxu1 }
 0x1e9   : > { %v485_v17 = vpop.f32.mrb[6].mxu1 }
 0x1ea   : > { %493 = vst.msk [vmem:[%s1168_s14 + $0x20] sm:$0xff] %vm488_vm3, %v483_v15  ;;  %v814_v18 = vpop.f32.mrb[7].mxu1 }
 0x1eb   : > { %s1250_s18 = smov (!%p503_p8, %s502_s18), 5 }
 0x1ec   : > { %s745_s23 = sshll.u32 %s1250_s18, 7 }
 0x1ed   : > { %p748_p9 = scmp.eq.s32.totalorder %s745_s23, 0 }
 0x1ee   : > { %941 = sdivrem.u32 (!%p748_p9), %s1250_s18, 5 }
 0x1ef   : > { %511 = sbr.rel (%p748_p9) target bundleno = 552 (0x228), region = 48 }
 0x1f7   : > { %s1193_s26 = spop.drf %941 }
 0x1f8   : > { %p749_p10 = scmp.le.s32.totalorder %s1193_s26, 0 }
 0x1f9   : > { %s1243_s21 = smov (!%p749_p10), %s1187_s20  ;;  %s1244_s29 = smov (!%p749_p10), %s1168_s14 }
 0x1fa   : > { %683 = sbr.rel (%p749_p10) target bundleno = 523 (0x20b), region = 124  ;;  %s1202_s24 = smov (!%p749_p10), 0  }
 0x1fb   : > { %s1204_s27 = smov (!%p749_p10), 0  }
 0x201 LB: >> { %v583_v19 = vld [vmem:[%s1007_s29] sm:$0xff]  ;;  %v585_v20 = vld [vmem:[%s1007_s29 + $0x8] sm:$0xff]  ;;  %v587_v21 = vld [vmem:[%s1007_s29 + $0x10] sm:$0xff]  ;;  %s593_s28 = sadd.s32 1, %s1011_s24  ;;  %s577_s27 = sadd.s32 1, %s1015_s27   ;;  %s1015_s27 = sphi %s1204_s27, %s577_s27   ;;  %s1011_s24 = sphi %s1202_s24, %s1245_s24   ;;  %s1007_s29 = sphi %s1244_s29, %s598_s29   ;;  %s1003_s21 = sphi %s1243_s21, %s599_s21  }
 0x202   : >> { %584 = vst [vmem:[%s1003_s21] sm:$0xff] %v583_v19  ;;  %586 = vst [vmem:[%s1003_s21 + $0x8] sm:$0xff] %v585_v20  ;;  %v589_v22 = vld [vmem:[%s1007_s29 + $0x18] sm:$0xff]  ;;  %v591_v23 = vld [vmem:[%s1007_s29 + $0x20] sm:$0xff]  ;;  %p594_p11 = scmp.ge.s32.totalorder %s593_s28, %s1193_s26  ;;  %p576_p12 = scmp.ge.s32.totalorder %s577_s27, %s1193_s26 }
 0x203   : >> { %588 = vst [vmem:[%s1003_s21 + $0x10] sm:$0xff] %v587_v21  ;;  %590 = vst [vmem:[%s1003_s21 + $0x18] sm:$0xff] %v589_v22 }
 0x204   : >> { %592 = vst [vmem:[%s1003_s21 + $0x20] sm:$0xff] %v591_v23  ;;  %s1252_s28 = smov (%p594_p11, %s593_s28), 0  ;;  %579 = sbr.rel (!%p576_p12) target bundleno = 513 (0x201), region = 130 }
 0x205   : >> { %s596_s30 = smul.u32 40, %s1252_s28  ;;  %s1245_s24 = smov %s1252_s28 }
 0x207   : >> { %s598_s29 = scalar_lea.vmem %s1168_s14, %s596_s30 [#allocation2]   ;;  %s599_s21 = scalar_lea.vmem %s1187_s20, %s596_s30  }
 0x20b PF: > { %943 = sdivrem.u32 %s1250_s18, 5 }
 0x20c   : > { %s750_s6 = smul.u32 40, %s1193_s26 }
 0x20e   : > { %s604_s7 = scalar_lea.vmem %s1168_s14, %s750_s6 [#allocation2]   ;;  %s606_s8 = scalar_lea.vmem %s1187_s20, %s750_s6  }
 0x214   : > { %s944_s9 = spop.drf %943 }
 0x215   : > { %p752_p13 = scmp.le.s32.totalorder %s944_s9, 0 }
 0x216   : > { %s1017_s10 = smov (!%p752_p13), %s606_s8   ;;  %s1021_s11 = smov (!%p752_p13), %s604_s7  }
 0x217   : > { %697 = sbr.rel (%p752_p13) target bundleno = 552 (0x228), region = 135  ;;  %s1025_s12 = smov (!%p752_p13), 0  }
 0x218   : > { %s1029_s13 = smov (!%p752_p13), 0  }
 0x21e LB: >> { %v616_v24 = vld [vmem:[%s1023_s11] sm:$0xff]  ;;  %s618_s15 = sadd.s32 1, %s1027_s12  ;;  %s610_s13 = sadd.s32 1, %s1031_s13   ;;  %s1031_s13 = sphi %s1029_s13, %s610_s13   ;;  %s1027_s12 = sphi %s1025_s12, %s1026_s12   ;;  %s1023_s11 = sphi %s1021_s11, %s623_s11   ;;  %s1019_s10 = sphi %s1017_s10, %s624_s10  }
 0x21f   : >> { %617 = vst [vmem:[%s1019_s10] sm:$0xff] %v616_v24  ;;  %p619_p0 = scmp.ge.s32.totalorder %s618_s15, %s944_s9  ;;  %p609_p1 = scmp.ge.s32.totalorder %s610_s13, %s944_s9 }
 0x221   : >> { %s1254_s15 = smov (%p619_p0, %s618_s15), 0  ;;  %612 = sbr.rel (!%p609_p1) target bundleno = 542 (0x21e), region = 141 }
 0x222   : >> { %s753_s14 = sshll.u32 %s1254_s15, 3  ;;  %s1026_s12 = smov %s1254_s15  }
 0x223   : >> { %s623_s11 = scalar_lea.vmem %s604_s7, %s753_s14 [#allocation2]   ;;  %s624_s10 = scalar_lea.vmem %s606_s8, %s753_s14  }
 0x228 PF: > { %p12_p2 = scmp.ge.s32.totalorder %s1080_s22, 4   ;;  %s1246_s18 = smov %s995_s19 }
 0x229   : > { %s1247_s19 = smov %s1088_s25  ;;  %s1248_s20 = smov %s1080_s22 }
 0x22a   :  { %14 = sbr.rel (!%p12_p2) target bundleno = 2 (0x2), region = 152 }

</bundles_post_ra>
